<compile_context>
chip_gen: v7x
topology: tpu7x:2x2x1
jax: 0.10.0
libtpu: 0.0.40
codegen_flags: <defaults>
</compile_context>

<pallas_src>
import jax
import jax.numpy as jnp
from jax.experimental import pallas as pl
from jax.experimental.pallas import tpu as pltpu

IN_FEATURES = 28 * 28      # 784
OUT_FEATURES = 10
N_PAD = 128                # lane-dense padded output width
DEFAULT_TILE_B = 2048      # batch rows per grid step for large B


def _linear_kernel(x_ref, wt_ref, b_ref, o_ref):
    # x_ref:  (TILE_B, 784)  f32  in VMEM (native dtype, cast here -> bf16)
    # wt_ref: (784, 128)     bf16 in VMEM (pre-transposed W, cols 10..127 zero)
    # b_ref:  (1, 128)       f32  in VMEM (zero-padded bias)
    # o_ref:  (TILE_B, 128)  bf16 in VMEM (lane-dense -> unmasked stores)
    x_bf = x_ref[...].astype(jnp.bfloat16)          # VPU cast, hidden under DMA
    acc = jnp.dot(x_bf, wt_ref[...], preferred_element_type=jnp.float32)
    o_ref[...] = (acc + b_ref[...]).astype(o_ref.dtype)


def prepare_params(weight, bias):
    """One-time layout prep.

    weight: (10, 784) PyTorch nn.Linear layout (out_features, in_features)
    bias:   (10,)
    returns:
      wt:     (784, 128) bf16  -- W^T, zero-padded along N to 128 lanes
      b_pad:  (1, 128)   f32   -- bias, zero-padded along N to 128 lanes
    """
    w_pad = jnp.zeros((N_PAD, IN_FEATURES), jnp.float32)
    w_pad = w_pad.at[:OUT_FEATURES].set(weight.astype(jnp.float32))
    wt = w_pad.T.astype(jnp.bfloat16)                       # (784, 128)

    b_pad = jnp.zeros((1, N_PAD), jnp.float32)
    b_pad = b_pad.at[0, :OUT_FEATURES].set(bias.astype(jnp.float32))
    return wt, b_pad


def _round_up(n, m):
    return ((n + m - 1) // m) * m


def _choose_tile(B, tile_b):
    """Pick the batch tile height (static, shapes are known at trace time)."""
    b16 = _round_up(B, 16)
    if b16 <= 512:
        # Tiny batch: one sublane/bf16-packing aligned block, grid of 1.
        return b16
    if b16 <= 2 * tile_b:
        # Medium batch: force >= 2 grid steps so v7x can shard the
        # "parallel" batch axis across both TensorCores.
        return _round_up(pl.cdiv(B, 2), 16)
    return tile_b


def simple_model_forward(x, wt, b_pad, *, tile_b=DEFAULT_TILE_B):
    """Pallas equivalent of SimpleModel.forward: y = x.view(-1, 784) @ W^T + b.

    x:     any shape whose elements flatten to (B, 784) row-major
           (e.g. (B, 1, 28, 28) NCHW or (B, 784)); read in its native dtype.
    wt:    (784, 128) bf16 from prepare_params
    b_pad: (1, 128)   f32  from prepare_params
    returns (B, 10) f32 logits
    """
    x2d = x.reshape(-1, IN_FEATURES)     # torch: x.view(-1, 784)
    B = x2d.shape[0]

    tb = _choose_tile(B, tile_b)
    grid = (pl.cdiv(B, tb),)             # ragged last block: Pallas masks it

    cost = pl.CostEstimate(
        flops=2 * B * IN_FEATURES * N_PAD,
        transcendentals=0,
        bytes_accessed=(x2d.dtype.itemsize * B * IN_FEATURES   # x read (once)
                        + 2 * IN_FEATURES * N_PAD              # bf16 weight
                        + 2 * B * N_PAD                        # bf16 output
                        + 4 * N_PAD),                          # bias
    )

    out = pl.pallas_call(
        _linear_kernel,
        out_shape=jax.ShapeDtypeStruct((B, N_PAD), jnp.bfloat16),
        grid_spec=pltpu.PrefetchScalarGridSpec(
            num_scalar_prefetch=0,
            grid=grid,
            in_specs=[
                pl.BlockSpec((tb, IN_FEATURES), lambda i: (i, 0)),
                pl.BlockSpec((IN_FEATURES, N_PAD), lambda i: (0, 0)),
                pl.BlockSpec((1, N_PAD), lambda i: (0, 0)),
            ],
            out_specs=pl.BlockSpec((tb, N_PAD), lambda i: (i, 0)),
        ),
        compiler_params=pltpu.CompilerParams(
            dimension_semantics=("parallel",),
        ),
        cost_estimate=cost,
    )(x2d, wt, b_pad)

    # Slice away N padding / ghost rows, cast tiny (B,10) back to f32.
    return out[:B, :OUT_FEATURES].astype(jnp.float32)


def init_params(key):
    """Deterministic init matching nn.Linear(784, 10) shapes.

    PyTorch default init is U(-1/sqrt(fan_in), 1/sqrt(fan_in)); reproduced
    deterministically with JAX PRNG.
    """
    k_w, k_b = jax.random.split(key)
    fan_in = IN_FEATURES
    bound = 1.0 / jnp.sqrt(jnp.float32(fan_in))
    weight = jax.random.uniform(k_w, (OUT_FEATURES, fan_in), jnp.float32, -bound, bound)
    bias = jax.random.uniform(k_b, (OUT_FEATURES,), jnp.float32, -bound, bound)
    return weight, bias


if __name__ == "__main__":
    key = jax.random.PRNGKey(0)
    k_x, k_x2, k_p = jax.random.split(key, 3)

    weight, bias = init_params(k_p)
    # One-time weight layout prep (transpose + N-pad + bf16 cast).
    wt, b_padded = prepare_params(weight, bias)

    fwd = jax.jit(simple_model_forward)

    # Small MNIST-like batch: (B, C, H, W) = (2, 1, 28, 28)
    x = jax.random.normal(k_x, (2, 1, 28, 28), dtype=jnp.float32)
    y = jax.block_until_ready(fwd(x, wt, b_padded))
    y_ref = x.reshape(-1, IN_FEATURES) @ weight.T + bias
    assert y.shape == (2, 10), y.shape
    assert jnp.allclose(y, y_ref, atol=2e-2, rtol=2e-2), (
        float(jnp.max(jnp.abs(y - y_ref))))

    # Second small case exercising the ragged (non-multiple-of-tile) path.
    x2 = jax.random.normal(k_x2, (37, IN_FEATURES), dtype=jnp.float32)
    y2 = jax.block_until_ready(fwd(x2, wt, b_padded))
    y2_ref = x2 @ weight.T + bias
    assert y2.shape == (37, 10), y2.shape
    assert jnp.allclose(y2, y2_ref, atol=2e-2, rtol=2e-2), (
        float(jnp.max(jnp.abs(y2 - y2_ref))))

    print("KERNEL_OK")
</pallas_src>

<mosaic_0001>
module attributes {stable_mosaic.version = 11 : i64} {
  func.func @_linear_kernel(%arg0: i32, %arg1: memref<16x784xf32, #tpu.memory_space<vmem>>, %arg2: memref<784x128xbf16, #tpu.memory_space<vmem>>, %arg3: memref<1x128xf32, #tpu.memory_space<vmem>>, %arg4: memref<16x128xbf16, #tpu.memory_space<vmem>>) attributes {dimension_semantics = [#tpu.dimension_semantics<parallel>], iteration_bounds = array<i64: 1>, scalar_prefetch = 0 : i64, scratch_operands = 0 : i64, tpu.core_type = #tpu.core_type<tc>, window_params = [{transform_indices = @transform_0, window_bounds = array<i64: 16, 784>}, {pipeline_mode = #tpu.pipeline_mode<synchronous>, transform_indices = @transform_1, window_bounds = array<i64: 784, 128>}, {pipeline_mode = #tpu.pipeline_mode<synchronous>, transform_indices = @transform_2, window_bounds = array<i64: 1, 128>}, {transform_indices = @transform_3, window_bounds = array<i64: 16, 128>}]} {
    %c0 = arith.constant 0 : index
    %c0_0 = arith.constant 0 : index
    %0 = vector.load %arg1[%c0, %c0_0] : memref<16x784xf32, #tpu.memory_space<vmem>>, vector<16x784xf32>
    %1 = arith.truncf %0 : vector<16x784xf32> to vector<16x784xbf16>
    %c0_1 = arith.constant 0 : index
    %c0_2 = arith.constant 0 : index
    %2 = vector.load %arg2[%c0_1, %c0_2] : memref<784x128xbf16, #tpu.memory_space<vmem>>, vector<784x128xbf16>
    %cst = arith.constant dense<0.000000e+00> : vector<16x128xf32>
    %3 = tpu.matmul %1, %2, %cst {dimension_numbers = #tpu.dot_dimension_numbers<[1], [0], [0], [1], [0, 0, 1, 1], [], []>} : vector<16x784xbf16>, vector<784x128xbf16>, vector<16x128xf32> -> vector<16x128xf32>
    %c0_3 = arith.constant 0 : index
    %c0_4 = arith.constant 0 : index
    %4 = vector.load %arg3[%c0_3, %c0_4] : memref<1x128xf32, #tpu.memory_space<vmem>>, vector<1x128xf32>
    %5 = vector.broadcast %4 : vector<1x128xf32> to vector<16x128xf32>
    %6 = arith.addf %3, %5 : vector<16x128xf32>
    %7 = arith.truncf %6 : vector<16x128xf32> to vector<16x128xbf16>
    %c0_5 = arith.constant 0 : index
    %c0_6 = arith.constant 0 : index
    %8 = vector.load %arg4[%c0_5, %c0_6] : memref<16x128xbf16, #tpu.memory_space<vmem>>, vector<16x128xbf16>
    tpu.vector_store %arg4[%c0_5, %c0_6], %7 {strides = array<i32>} : memref<16x128xbf16, #tpu.memory_space<vmem>>, vector<16x128xbf16>,
    return
  }
  func.func @transform_0(%arg0: i32) -> (i32, i32) {
    %c0_i32 = arith.constant 0 : i32
    %c0_i32_0 = arith.constant 0 : i32
    return %arg0, %c0_i32 : i32, i32
  }
  func.func @transform_1(%arg0: i32) -> (i32, i32) {
    %c0_i32 = arith.constant 0 : i32
    %c0_i32_0 = arith.constant 0 : i32
    %c0_i32_1 = arith.constant 0 : i32
    return %c0_i32, %c0_i32_0 : i32, i32
  }
  func.func @transform_2(%arg0: i32) -> (i32, i32) {
    %c0_i32 = arith.constant 0 : i32
    %c0_i32_0 = arith.constant 0 : i32
    %c0_i32_1 = arith.constant 0 : i32
    return %c0_i32, %c0_i32_0 : i32, i32
  }
  func.func @transform_3(%arg0: i32) -> (i32, i32) {
    %c0_i32 = arith.constant 0 : i32
    %c0_i32_0 = arith.constant 0 : i32
    return %arg0, %c0_i32 : i32, i32
  }
}

</mosaic_0001>

<bundles_post_ra>
// kernel: simple_model_forward.1
= control target key start
LH: loop header
LB: loop body
LE: loop exit
PB: predicated region body
PF: predicated region fallthrough
CT: control target
= control target key end

     0   :  { %8 = vsyncpa [#allocation3], 0  ;;  %s1132_s12 = smov [#allocation2]   ;;  %s1247_s0 = inlined_call_operand.vmem [shape: f32[2,784], index: 0, kind: input, shape index: {}]   ;;  %s1248_s1 = inlined_call_operand.hbm [shape: bf16[784,128], index: 1, kind: input, shape index: {}]   ;;  %s1249_s2 = inlined_call_operand.vmem [shape: f32[1,128], index: 2, kind: input, shape index: {}]   ;;  %s1250_s3 = inlined_call_operand.vmem [shape: bf16[2,128], index: 3, kind: output, shape index: {}]  }
   0x1   :  { %s16_s13 = sshll.u32 %s1132_s12, 4  ;;  %s1108_s16 = scalar_lea.hbm %s1248_s1, 6272  ;;  %s17_s13 = int_to_ptr.vmem [resolvable:$true] %s16_s13 }
   0x2   :  { %p1109_p0 = scmp.ne.s32.totalorder %s1248_s1, %s1108_s16  ;;  %p1112_p1 = scmp.lt.u32.totalorder %s1108_s16, %s1248_s1 }
   0x4   :  { %p1114_p2 = pnand %p1112_p1, %p1109_p0 }
   0x6   :  { %1117 = shalt.err (!%p1114_p2)
}
   0x7   :  { %s1118_s21 = scalar_lea.vmem %s17_s13, 6272  ;;  %p1123_p4 = scmp.lt.s32.totalorder %s17_s13, %s17_s13 }
   0x8   :  { %p1119_p3 = scmp.ne.s32.totalorder %s17_s13, %s1118_s21  ;;  %p1124_p5 = scmp.lt.s32.totalorder %s1118_s21, %s1118_s21 }
   0xa   :  { %p1125_p6 = por %p1124_p5, %p1123_p4 }
   0xc   :  { %p1126_p7 = pnand %p1125_p6, %p1119_p3 }
   0xe   :  { %1129 = shalt.err (!%p1126_p7)
}
   0xf   :  { %s1133_s22 = smov 64   ;;  %s1134_s23 = smov 4  }
  0x10   :  { %22 = dma.hbm_to_vmem [thread:$0]  %s1248_s1, 6272, %s17_s13, [#allocation3], %s1133_s22, %s1133_s22, %s1134_s23  }
  0x11   :  { %1130 = dma.done.wait [#allocation3], 6272  }
  0x12   :  { %1131 = vsyncadd [#allocation3], 4294961024  ;;  %v1035_v0 = vld [vmem:[#allocation2 + $0x40] sm:$0xff]   ;;  %v1039_v4 = vld [vmem:[#allocation2 + $0x48] sm:$0xff]   ;;  %v1135_v24 = vmov 1983009808   ;;  %v68_v26 = vlaneseq }
  0x13   :  { %v1036_v1 = vld [vmem:[#allocation2] sm:$0xff]   ;;  %954 = vmatprep.subr.bf16.mxu0 %v1035_v0  ;;  %v1040_v5 = vld [vmem:[#allocation2 + $0x8] sm:$0xff]   ;;  %v1043_v8 = vld [vmem:[#allocation2 + $0x50] sm:$0xff]   ;;  %v66_v25 = vunpack.c.l.s4 %v1135_v24  ;;  %v1136_v58 = vmov 0.0   ;;  %vm1137_vm0 = vmmov 0   ;;  %vm623_vm1 = vcmask 130048  }
  0x14   :  { %v1037_v2 = vld [vmem:[#allocation2 + $0xc0] sm:$0xff]   ;;  %955 = vmatpush3.bf16.msra.mxu0 %v1036_v1  ;;  %v1041_v6 = vld [vmem:[#allocation2 + $0xc8] sm:$0xff]   ;;  %v1044_v9 = vld [vmem:[#allocation2 + $0x10] sm:$0xff]   ;;  %v1171_v32 = vshrl.u32 %v68_v26, 7 }
  0x15   :  { %v1038_v3 = vld [vmem:[#allocation2 + $0x80] sm:$0xff]   ;;  %976 = vmatprep.subr.bf16.mxu1 %v1037_v2  ;;  %956 = vmatprep.subr.bf16.mxu0 %v1039_v4  ;;  %v1042_v7 = vld [vmem:[#allocation2 + $0x88] sm:$0xff]   ;;  %v1045_v10 = vld [vmem:[#allocation2 + $0xd0] sm:$0xff]   ;;  %v67_v31 = vunpack.c.0.s8 %v66_v25 }
  0x16   :  { %977 = vmatpush3.bf16.msra.mxu1 %v1038_v3  ;;  %v1046_v11 = vld [vmem:[#allocation2 + $0x90] sm:$0xff]   ;;  %v1047_v12 = vld [vmem:[#allocation2 + $0x58] sm:$0xff]   ;;  %v1051_v16 = vld [vmem:[#allocation2 + $0x60] sm:$0xff]  }
  0x17   :  { %978 = vmatprep.subr.bf16.mxu1 %v1041_v6  ;;  %v1048_v13 = vld [vmem:[#allocation2 + $0x18] sm:$0xff]   ;;  %v1052_v17 = vld [vmem:[#allocation2 + $0x20] sm:$0xff]   ;;  %v1055_v20 = vld [vmem:[#allocation2 + $0x68] sm:$0xff]   ;;  %v1174_v36 = vsub.s32 %v67_v31, %v1171_v32 }
  0x18   :  { %957 = vmatpush3.bf16.msra.mxu0 %v1040_v5  ;;  %v1049_v14 = vld [vmem:[#allocation2 + $0xd8] sm:$0xff]   ;;  %v1053_v18 = vld [vmem:[#allocation2 + $0xe0] sm:$0xff]   ;;  %v1056_v21 = vld [vmem:[#allocation2 + $0x28] sm:$0xff]  }
  0x19   :  { %958 = vmatprep.subr.bf16.mxu0 %v1043_v8  ;;  %v1050_v15 = vld [vmem:[#allocation2 + $0x98] sm:$0xff]   ;;  %v1054_v19 = vld [vmem:[#allocation2 + $0xa0] sm:$0xff]   ;;  %v1057_v22 = vld [vmem:[#allocation2 + $0xe8] sm:$0xff]  }
  0x1a   :  { %979 = vmatpush3.bf16.msra.mxu1 %v1042_v7  ;;  %v1058_v23 = vld [vmem:[#allocation2 + $0xa8] sm:$0xff]   ;;  %v1059_v27 = vld [vmem:[#allocation2 + $0x70] sm:$0xff]   ;;  %v1063_v33 = vld [vmem:[#allocation2 + $0x78] sm:$0xff]  }
  0x1b   :  { %980 = vmatprep.subr.bf16.mxu1 %v1045_v10  ;;  %v1060_v28 = vld [vmem:[#allocation2 + $0x30] sm:$0xff]   ;;  %v1064_v34 = vld [vmem:[#allocation2 + $0x38] sm:$0xff]   ;;  %v1075_v46 = vld [vmem:[#allocation2 + $0x140] sm:$0xff]  }
  0x1c   :  { %959 = vmatpush3.bf16.msra.mxu0 %v1044_v9  ;;  %v1061_v29 = vld [vmem:[#allocation2 + $0xf0] sm:$0xff]   ;;  %v1065_v35 = vld [vmem:[#allocation2 + $0xf8] sm:$0xff]   ;;  %v1080_v62 = vld [vmem:[#allocation2 + $0x100] sm:$0xff]  }
  0x1d   :  { %960 = vmatprep.subr.bf16.mxu0 %v1047_v12  ;;  %v1062_v30 = vld [vmem:[#allocation2 + $0xb0] sm:$0xff]   ;;  %v1068_v38 = vld [vmem:[%s1247_s0 + $0x1c] ss:$14 sps:$4 sm:$0xff]   ;;  %v1070_v39 = vld [vmem:[%s1247_s0 + $0x38] ss:$14 sps:$4 sm:$0xff]  }
  0x1e   :  { %981 = vmatpush3.bf16.msra.mxu1 %v1046_v11  ;;  %v1066_v37 = vld [vmem:[%s1247_s0] ss:$14 sps:$4 sm:$0xff]   ;;  %v1074_v42 = vld [vmem:[#allocation2 + $0xb8] sm:$0xff]   ;;  %v85_v43 = vrot.slane %v1068_v38, %v1174_v36  ;;  %v142_v44 = vrot.slane %v1070_v39, %v1174_v36  ;;  %v1076_v47 = vld [vmem:[%s1247_s0 + $0x4] ss:$14 sps:$4 sm:$0xff]  }
  0x1f   :  { %982 = vmatprep.subr.bf16.mxu1 %v1049_v14  ;;  %v1072_v40 = vld [vmem:[%s1247_s0 + $0x54] ss:$14 sps:$4 sm:$0xff]   ;;  %v71_v41 = vrot.slane %v1066_v37, %v1174_v36  ;;  %v1078_v49 = vld [vmem:[%s1247_s0 + $0x3c] ss:$14 sps:$4 sm:$0xff]   ;;  %v1079_v54 = vld [vmem:[%s1247_s0 + $0x58] ss:$14 sps:$4 sm:$0xff]   ;;  %v78_v55 = vrot.slane %v1076_v47, %v1174_v36 }
  0x20   :  { %961 = vmatpush3.bf16.msra.mxu0 %v1048_v13  ;;  %v156_v45 = vrot.slane %v1072_v40, %v1174_v36  ;;  %v1077_v48 = vld [vmem:[%s1247_s0 + $0x20] ss:$14 sps:$4 sm:$0xff]   ;;  %v149_v57 = vrot.slane %v1078_v49, %v1174_v36  ;;  %v163_v61 = vrot.slane %v1079_v54, %v1174_v36  ;;  %v1085_v9 = vld [vmem:[#allocation2 + $0x158] sm:$0xff]  }
  0x21   :  { %962 = vmatprep.subr.bf16.mxu0 %v1051_v16  ;;  %v94_v50 = vcombine.high %v71_v41, %v85_v43  ;;  %v93_v52 = vcombine.low %v71_v41, %v85_v43  ;;  %v92_v56 = vrot.slane %v1077_v48, %v1174_v36  ;;  %v1081_v1 = vld [vmem:[#allocation2 + $0x148] sm:$0xff]   ;;  %v1083_v7 = vld [vmem:[#allocation2 + $0x150] sm:$0xff]   ;;  %v1086_v10 = vld [vmem:[#allocation2 + $0x118] sm:$0xff]  }
  0x22   :  { %983 = vmatpush3.bf16.msra.mxu1 %v1050_v15  ;;  %v165_v51 = vcombine.high %v142_v44, %v156_v45  ;;  %v164_v53 = vcombine.low %v142_v44, %v156_v45  ;;  %v167_v2 = vcombine.high %v149_v57, %v163_v61  ;;  %v166_v3 = vcombine.low %v149_v57, %v163_v61  ;;  %v1082_v6 = vld [vmem:[#allocation2 + $0x108] sm:$0xff]   ;;  %v1084_v8 = vld [vmem:[#allocation2 + $0x110] sm:$0xff]   ;;  %v1087_v11 = vld [vmem:[#allocation2 + $0x160] sm:$0xff]  }
  0x23   :  { %984 = vmatprep.subr.bf16.mxu1 %v1053_v18  ;;  %v96_v63 = vcombine.high %v78_v55, %v92_v56  ;;  %v95_v0 = vcombine.low %v78_v55, %v92_v56  ;;  %v1088_v12 = vld [vmem:[#allocation2 + $0x120] sm:$0xff]   ;;  %v1089_v14 = vld [vmem:[#allocation2 + $0x168] sm:$0xff]   ;;  %v1092_v37 = vld [vmem:[#allocation2 + $0x130] sm:$0xff]  }
  0x24   :  { %963 = vmatpush3.bf16.msra.mxu0 %v1052_v17  ;;  %v218_v59 = vpack.c.bf16 %v165_v51, %v94_v50  ;;  %v217_v60 = vpack.c.bf16 %v164_v53, %v93_v52  ;;  %v1095_v13 = vld [vmem:[#allocation2 + $0x180] sm:$0xff]   ;;  %v1096_v15 = vld [vmem:[%s1247_s0 + $0x8] ss:$14 sps:$4 sm:$0xff]   ;;  %v1098_v16 = vld [vmem:[%s1247_s0 + $0xc] ss:$14 sps:$4 sm:$0x33]  }
  0x25   :  { %964 = vmatprep.subr.bf16.mxu0 %v1055_v20  ;;  %v220_v4 = vpack.c.bf16 %v167_v2, %v96_v63  ;;  %v219_v5 = vpack.c.bf16 %v166_v3, %v95_v0  ;;  %v1099_v17 = vld [vmem:[%s1247_s0 + $0x24] ss:$14 sps:$4 sm:$0xff]   ;;  %v1101_v18 = vld [vmem:[%s1247_s0 + $0x28] ss:$14 sps:$4 sm:$0x33]   ;;  %v114_v20 = vrot.slane %v1098_v16, %v1174_v36  ;;  %v1093_v40 = vld [vmem:[#allocation2 + $0x178] sm:$0xff]  }
  0x26   :  { %985 = vmatpush3.bf16.msra.mxu1 %v1054_v19  ;;  %659 = vmatprep.mubr.bf16.mxu0 %v218_v59  ;;  %v107_v19 = vrot.slane %v1096_v15, %v1174_v36  ;;  %v121_v24 = vrot.slane %v1099_v17, %v1174_v36  ;;  %v128_v25 = vrot.slane %v1101_v18, %v1174_v36  ;;  %v1105_v26 = vld [vmem:[%s1247_s0 + $0x5c] ss:$14 sps:$4 sm:$0xff]   ;;  %v898_v47 = vld [vmem:[%s1249_s2] ss:$0 sm:$0xff] }
  0x27   :  { %986 = vmatprep.subr.bf16.mxu1 %v1057_v22  ;;  %700 = vmatprep.mubr.bf16.mxu1 %v220_v4  ;;  %v1104_v22 = vld [vmem:[%s1247_s0 + $0x44] ss:$14 sps:$4 sm:$0x33]   ;;  %v1094_v45 = vld [vmem:[#allocation2 + $0x138] sm:$0xff]   ;;  %v1138_v4 = vmov 1966171168  }
  0x28   :  { %965 = vmatpush3.bf16.msra.mxu0 %v1056_v21  ;;  %v1102_v21 = vld [vmem:[%s1247_s0 + $0x40] ss:$14 sps:$4 sm:$0xff]   ;;  %v130_v31 = vcombine.high %v107_v19, %v121_v24  ;;  %v129_v43 = vcombine.low %v107_v19, %v121_v24 }
  0x29   :  { %966 = vmatprep.subr.bf16.mxu0 %v1059_v27  ;;  %v1107_v27 = vld [vmem:[%s1247_s0 + $0x60] ss:$14 sps:$4 sm:$0x33]  }
  0x2a   :  { %987 = vmatpush3.bf16.msra.mxu1 %v1058_v23  ;;  %v1090_v23 = vld [vmem:[#allocation2 + $0x128] sm:$0xff]  }
  0x2b   :  { %988 = vmatprep.subr.bf16.mxu1 %v1061_v29  ;;  %v178_v29 = vrot.slane %v1102_v21, %v1174_v36 }
  0x2c   :  { %967 = vmatpush3.bf16.msra.mxu0 %v1060_v28  ;;  %v1091_v28 = vld [vmem:[#allocation2 + $0x170] sm:$0xff]  }
  0x2d   :  { %968 = vmatprep.subr.bf16.mxu0 %v1063_v33  ;;  %v192_v33 = vrot.slane %v1105_v26, %v1174_v36 }
  0x2e   :  { %989 = vmatpush3.bf16.msra.mxu1 %v1062_v30  ;;  %v185_v30 = vrot.slane %v1104_v22, %v1174_v36 }
  0x2f   :  { %990 = vmatprep.subr.bf16.mxu1 %v1065_v35  ;;  %v131_v35 = vcombine.low %v114_v20, %v128_v25  ;;  %v201_v38 = vcombine.high %v178_v29, %v192_v33  ;;  %v200_v44 = vcombine.low %v178_v29, %v192_v33 }
  0x30   :  { %969 = vmatpush3.bf16.msra.mxu0 %v1064_v34  ;;  %v199_v34 = vrot.slane %v1107_v27, %v1174_v36 }
  0x31   :  { %998 = vmatprep.subr.bf16.mxu0 %v1075_v46  ;;  %v222_v41 = vpack.c.bf16 %v201_v38, %v130_v31  ;;  %v221_v46 = vpack.c.bf16 %v200_v44, %v129_v43 }
  0x32   :  { %991 = vmatpush3.bf16.msra.mxu1 %v1074_v42  ;;  %v202_v39 = vcombine.low %v185_v30, %v199_v34 }
  0x33   :  { %1022 = vmatprep.subr.bf16.mxu1 %v1136_v58  ;;  %660 = vmatmul.mubr.bf16.vlgmr.msra.gmra.mrb[0].mxu0 %v217_v60 }
  0x34   :  { %999 = vmatpush3.bf16.msra.mxu0 %v1080_v62  ;;  %v223_v42 = vpack.c.bf16 %v202_v39, %v131_v35  ;;  %741 = vmatprep.mubr.bf16.mxu0 %v222_v41 }
  0x35   :  { %1000 = vmatprep.subr.bf16.mxu0 %v1081_v1  ;;  %701 = vmatmul.mubr.bf16.vlgmr.msra.gmra.mrb[0].mxu1 %v219_v5  ;;  %v795_v5 = vunpack.c.l.s4 %v1138_v4 }
  0x36   :  { %1024 = vmatprep.mubr.msk.bf16.mxu1 %vm1137_vm0, %v1136_v58  ;;  %1023 = vmatpush3.bf16.msra.mxu1 %v1095_v13 }
  0x38   :  { %1001 = vmatpush3.bf16.msra.mxu0 %v1082_v6 }
  0x39   :  { %1002 = vmatprep.subr.bf16.mxu0 %v1083_v7 }
  0x3c   :  { %1003 = vmatpush3.bf16.msra.mxu0 %v1084_v8 }
  0x3d   :  { %1004 = vmatprep.subr.bf16.mxu0 %v1085_v9  ;;  %1025 = vmatmul.mubr.msk.bf16.vlgmr.msra.gmra.mrb[4].mxu1 %vm623_vm1, %v223_v42 }
  0x40   :  { %1005 = vmatpush3.bf16.msra.mxu0 %v1086_v10 }
  0x41   :  { %1006 = vmatprep.subr.bf16.mxu0 %v1087_v11 }
  0x44   :  { %1007 = vmatpush3.bf16.msra.mxu0 %v1088_v12  ;;  %v796_v12 = vunpack.c.0.s8 %v795_v5 }
  0x45   :  { %1008 = vmatprep.subr.bf16.mxu0 %v1089_v14 }
  0x46   :  { %v799_v16 = vsub.s32 %v796_v12, %v1171_v32 }
  0x48   :  { %1009 = vmatpush3.bf16.msra.mxu0 %v1090_v23 }
  0x49   :  { %1010 = vmatprep.subr.bf16.mxu0 %v1091_v28 }
  0x4c   :  { %1011 = vmatpush3.bf16.msra.mxu0 %v1092_v37 }
  0x4d   :  { %1012 = vmatprep.subr.bf16.mxu0 %v1093_v40 }
  0x50   :  { %1013 = vmatpush3.bf16.msra.mxu0 %v1094_v45 }
  0x53   :  { %742 = vmatmul.mubr.bf16.vlgmr.msra.gmra.mrb[4].mxu0 %v221_v46 }
 0x106   :  { %v970_v36 = vpop.f32.mrb[0].mxu0 }
 0x107   :  { %v971_v48 = vpop.f32.mrb[1].mxu0 }
 0x108   :  { %v972_v49 = vadd.f32 %v971_v48, %v970_v36  ;;  %v973_v50 = vpop.f32.mrb[2].mxu0  ;;  %v992_v53 = vpop.f32.mrb[0].mxu1 }
 0x109   :  { %v974_v51 = vpop.f32.mrb[3].mxu0  ;;  %v993_v55 = vpop.f32.mrb[1].mxu1 }
 0x10a   :  { %v662_v52 = vadd.f32 %v972_v49, %v898_v47  ;;  %v975_v54 = vadd.f32 %v974_v51, %v973_v50  ;;  %v994_v57 = vadd.f32 %v993_v55, %v992_v53  ;;  %v995_v58 = vpop.f32.mrb[2].mxu1 }
 0x10b   :  { %v996_v59 = vpop.f32.mrb[3].mxu1 }
 0x10c   :  { %v665_v56 = vadd.f32 %v975_v54, %v898_v47  ;;  %v703_v60 = vadd.f32 %v994_v57, %v662_v52  ;;  %v997_v61 = vadd.f32 %v996_v59, %v995_v58 }
 0x10e   :  { %v706_v62 = vadd.f32 %v997_v61, %v665_v56 }
 0x110   :  { %v784_v63 = vpop.f32.mrb[4].mxu1 }
 0x111   :  { %v1026_v0 = vpop.f32.mrb[5].mxu1 }
 0x112   :  { %v787_v1 = vpop.f32.mrb[6].mxu1 }
 0x113   :  { %v1027_v2 = vpop.f32.mrb[7].mxu1 }
 0x126   :  { %v1014_v3 = vpop.f32.mrb[4].mxu0 }
 0x127   :  { %v1015_v6 = vpop.f32.mrb[5].mxu0 }
 0x128   :  { %v1016_v7 = vadd.f32 %v1015_v6, %v1014_v3  ;;  %v1017_v8 = vpop.f32.mrb[6].mxu0 }
 0x129   :  { %v1018_v9 = vpop.f32.mrb[7].mxu0 }
 0x12a   :  { %v744_v10 = vadd.f32 %v1016_v7, %v703_v60  ;;  %v1019_v11 = vadd.f32 %v1018_v9, %v1017_v8 }
 0x12c   :  { %v785_v13 = vadd.f32 %v784_v63, %v744_v10  ;;  %v747_v14 = vadd.f32 %v1019_v11, %v706_v62 }
 0x12e   :  { %v788_v15 = vadd.f32 %v787_v1, %v747_v14 }
 0x130   :  { %v791_v17 = vpack.c.bf16 %v788_v15, %v785_v13 }
 0x132   :  { %v800_v18 = vrot.slane %v791_v17, %v799_v16 }
 0x134   :  { %950 = vst.sshfl [vmem:[#allocation4] sm:$0x1 pattern:$0x73625140] %v800_v18 }
 0x13b   :  { %v875_v19 = vld [vmem:[#allocation4] sm:$0x1] }
 0x13c   :  { %876 = vst [vmem:[%s1250_s3] sm:$0x1] %v875_v19 }
 0x13d   :  { %893 = vsyncpa [#allocation3], 1 }

</bundles_post_ra>
